<compile_context>
chip_gen: v5e
topology: v5e:2x2
jax: 0.10.0
libtpu: 0.0.40
codegen_flags: <defaults>
</compile_context>

<pallas_src>
import functools

import jax
import jax.numpy as jnp
from jax.experimental import pallas as pl
from jax.experimental.pallas import tpu as pltpu

IN_DIM = 21 * 21   # 441
HID = 64


def _round_up(x, m):
    return ((x + m - 1) // m) * m


def actor_kernel(logits_ref, act_ref,
                 w1_ref, b1_ref, w2_ref, b2_ref, w3_ref, b3_ref,
                 out_ref):
    # ---- softmax numerator over the 441 input logits (dim=-1), f32 math ----
    x = logits_ref[...].astype(jnp.float32)                   # [TN, 441]
    m = jnp.max(x, axis=-1, keepdims=True)
    e = jnp.exp(x - m)                                         # [TN, 441] f32
    inv_s = pl.reciprocal(jnp.sum(e, axis=-1, keepdims=True), approx=True)  # [TN, 1]

    # ---- MLP: 441 -> 64 -> 64 -> PAD (bf16 operands, f32 accumulate) ----
    # Softmax denominator folded into the first matmul's output scale:
    #   relu((e @ W1) * (1/sum) + b1) == relu(softmax(x) @ W1 + b1)
    h1 = jnp.dot(e.astype(jnp.bfloat16), w1_ref[...],
                 preferred_element_type=jnp.float32)
    h1 = jnp.maximum(h1 * inv_s + b1_ref[...], 0.0)
    h2 = jnp.dot(h1.astype(jnp.bfloat16), w2_ref[...],
                 preferred_element_type=jnp.float32) + b2_ref[...]
    h2 = jnp.maximum(h2, 0.0)
    out = jnp.dot(h2.astype(jnp.bfloat16), w3_ref[...],
                  preferred_element_type=jnp.float32) + b3_ref[...]
    # out: [TN, PAD]; padded columns carry the -1e30 bias -> exp() == 0 below.

    # ---- log_softmax + gather log_prob(act) over the padded 128 lanes ----
    mo = jnp.max(out, axis=-1, keepdims=True)
    lse = jnp.log(jnp.sum(jnp.exp(out - mo), axis=-1, keepdims=True)) + mo
    logp = out - lse                                           # [TN, PAD]

    a = act_ref[...]                                           # [TN, 1] int32
    col = jax.lax.broadcasted_iota(jnp.int32, logp.shape, dimension=1)
    logp_sel = jnp.sum(jnp.where(col == a, logp, 0.0), axis=-1, keepdims=True)

    # Pack: cols [0, A) hold the Categorical logits, the last lane holds logp.
    # Single full-width (lane-dense) store per tile.
    out_ref[...] = jnp.where(col == (logp.shape[-1] - 1), logp_sel, out)


def prepare_params(params):
    """One-time prep (hoisted out of the per-call forward): bf16-cast weights
    for the MXU, pad W3/b3 to a 128-wide lane slab (padded bias = -1e30 so the
    padded lanes vanish from the log-sum-exp). Returns (prepared, act_dim)."""
    w1, b1, w2, b2, w3, b3 = params
    A = w3.shape[1]
    PAD = _round_up(A + 1, 128)          # logits lanes + one spare lane for logp
    w1b = w1.astype(jnp.bfloat16)
    w2b = w2.astype(jnp.bfloat16)
    w3b = jnp.zeros((HID, PAD), jnp.bfloat16).at[:, :A].set(w3.astype(jnp.bfloat16))
    b1f = b1.astype(jnp.float32)
    b2f = b2.astype(jnp.float32)
    b3p = jnp.full((1, PAD), -1e30, jnp.float32).at[:, :A].set(b3.astype(jnp.float32))
    return (w1b, b1f, w2b, b2f, w3b, b3p), A


@functools.partial(jax.jit, static_argnames=("act_dim", "block_rows"))
def categorical_actor_forward(dense_map, sparse_map, logits, act, prepared,
                              *, act_dim, block_rows=2048):
    """Returns (categorical_logits [N, act_dim], logp_a [N]).

    `prepared` comes from prepare_params(); dense_map / sparse_map are unused
    (matches the PyTorch module). `logits` may be f32 or bf16 (upcast in-kernel)."""
    del dense_map, sparse_map
    w1b, b1, w2b, b2, w3b, b3p = prepared
    N = logits.shape[0]
    PAD = w3b.shape[1]

    # Megacore-aware tile size: at least 2 grid tiles whenever N > 8 so both
    # v7x TensorCores get work; multiple of 8 sublanes; capped by block_rows.
    TN = max(8, min(block_rows, _round_up(-(-N // 2), 8)))
    grid = (pl.cdiv(N, TN),)             # partial last block handled by Pallas

    act2d = act.astype(jnp.int32).reshape(N, 1)

    const = lambda i: (0, 0)             # weights: fetched once, VMEM-resident
    packed = pl.pallas_call(
        actor_kernel,
        out_shape=jax.ShapeDtypeStruct((N, PAD), jnp.float32),
        grid=grid,
        in_specs=[
            pl.BlockSpec((TN, IN_DIM), lambda i: (i, 0)),   # logits tile (input dtype)
            pl.BlockSpec((TN, 1), lambda i: (i, 0)),        # act tile
            pl.BlockSpec((IN_DIM, HID), const),             # W1 (bf16)
            pl.BlockSpec((1, HID), const),                  # b1
            pl.BlockSpec((HID, HID), const),                # W2 (bf16)
            pl.BlockSpec((1, HID), const),                  # b2
            pl.BlockSpec((HID, PAD), const),                # W3 padded (bf16)
            pl.BlockSpec((1, PAD), const),                  # b3 padded (-1e30)
        ],
        out_specs=pl.BlockSpec((TN, PAD), lambda i: (i, 0)),
        compiler_params=pltpu.CompilerParams(
            dimension_semantics=("parallel",),
            vmem_limit_bytes=32 * 1024 * 1024),
    )(logits, act2d, w1b, b1, w2b, b2, w3b, b3p)

    out_logits = packed[:, :act_dim]
    logp_a = packed[:, PAD - 1]
    return out_logits, logp_a


def init_params(key, act_dim):
    """Deterministic init mimicking torch.nn.Linear (uniform +/- 1/sqrt(fan_in)).

    Weights stored [in, out] (transpose of torch layout). Biases stored [1, out]."""
    ks = jax.random.split(key, 6)

    def lin(kw, kb, fan_in, fan_out):
        bound = 1.0 / jnp.sqrt(fan_in)
        w = jax.random.uniform(kw, (fan_in, fan_out), jnp.float32, -bound, bound)
        b = jax.random.uniform(kb, (1, fan_out), jnp.float32, -bound, bound)
        return w, b

    w1, b1 = lin(ks[0], ks[1], IN_DIM, HID)
    w2, b2 = lin(ks[2], ks[3], HID, HID)
    w3, b3 = lin(ks[4], ks[5], HID, act_dim)
    return w1, b1, w2, b2, w3, b3


def reference_forward(logits, act, params):
    """Pure-f32 JAX reference matching the PyTorch module."""
    w1, b1, w2, b2, w3, b3 = params
    p = jax.nn.softmax(logits, axis=-1)
    h1 = jax.nn.relu(p @ w1 + b1)
    h2 = jax.nn.relu(h1 @ w2 + b2)
    out = h2 @ w3 + b3
    logp_all = jax.nn.log_softmax(out, axis=-1)
    logp = jnp.take_along_axis(logp_all, act.reshape(-1, 1), axis=-1)[:, 0]
    return out, logp


if __name__ == "__main__":
    key = jax.random.PRNGKey(0)
    k_params, k_dense, k_sparse, k_logits, k_act = jax.random.split(key, 5)

    ACT_DIM = 8
    params = init_params(k_params, ACT_DIM)
    prepared, act_dim = prepare_params(params)       # one-time weight prep

    # --- small spec-shaped example (batch=2) ---
    N = 2
    dense_map = jax.random.normal(k_dense, (N, IN_DIM, 6), jnp.float32)    # unused by forward
    sparse_map = jax.random.normal(k_sparse, (N, IN_DIM, 6), jnp.float32)  # unused by forward
    logits_in = jax.random.normal(k_logits, (N, IN_DIM), jnp.float32)
    act = jax.random.randint(k_act, (N,), 0, ACT_DIM, jnp.int32)

    out_logits, logp_a = categorical_actor_forward(dense_map, sparse_map,
                                                   logits_in, act, prepared,
                                                   act_dim=act_dim)
    out_logits = jax.block_until_ready(out_logits)
    logp_a = jax.block_until_ready(logp_a)

    ref_logits, ref_logp = reference_forward(logits_in, act, params)
    # bf16 MXU operands (f32 accumulate) + approx reciprocal vs. pure-f32 ref -> 2e-2 tol.
    assert jnp.allclose(out_logits, ref_logits, atol=2e-2, rtol=2e-2)
    assert jnp.allclose(logp_a, ref_logp, atol=2e-2, rtol=2e-2)

    # --- multi-tile grid check with a partial last block (no wrapper pad) ---
    N2 = 300
    k2_logits, k2_act = jax.random.split(jax.random.PRNGKey(1))
    logits2 = jax.random.normal(k2_logits, (N2, IN_DIM), jnp.float32)
    act2 = jax.random.randint(k2_act, (N2,), 0, ACT_DIM, jnp.int32)
    out2, logp2 = categorical_actor_forward(None, None, logits2, act2, prepared,
                                            act_dim=act_dim, block_rows=128)
    out2 = jax.block_until_ready(out2)
    logp2 = jax.block_until_ready(logp2)
    ref2_logits, ref2_logp = reference_forward(logits2, act2, params)
    assert jnp.allclose(out2, ref2_logits, atol=2e-2, rtol=2e-2)
    assert jnp.allclose(logp2, ref2_logp, atol=2e-2, rtol=2e-2)

    # --- bf16 input path (half the dominant DMA traffic; upcast in-kernel) ---
    logits_bf16 = logits_in.astype(jnp.bfloat16)
    out3, logp3 = categorical_actor_forward(None, None, logits_bf16, act, prepared,
                                            act_dim=act_dim)
    out3 = jax.block_until_ready(out3)
    logp3 = jax.block_until_ready(logp3)
    ref3_logits, ref3_logp = reference_forward(logits_bf16.astype(jnp.float32),
                                               act, params)
    assert jnp.allclose(out3, ref3_logits, atol=2e-2, rtol=2e-2)
    assert jnp.allclose(logp3, ref3_logp, atol=2e-2, rtol=2e-2)

    print("KERNEL_OK")
</pallas_src>

<mosaic_0001>
module attributes {stable_mosaic.version = 11 : i64} {
  func.func @actor_kernel(%arg0: i32, %arg1: memref<8x441xf32, #tpu.memory_space<vmem>>, %arg2: memref<8x1xi32, #tpu.memory_space<vmem>>, %arg3: memref<441x64xbf16, #tpu.memory_space<vmem>>, %arg4: memref<1x64xf32, #tpu.memory_space<vmem>>, %arg5: memref<64x64xbf16, #tpu.memory_space<vmem>>, %arg6: memref<1x64xf32, #tpu.memory_space<vmem>>, %arg7: memref<64x128xbf16, #tpu.memory_space<vmem>>, %arg8: memref<1x128xf32, #tpu.memory_space<vmem>>, %arg9: memref<8x128xf32, #tpu.memory_space<vmem>>) attributes {dimension_semantics = [#tpu.dimension_semantics<parallel>], iteration_bounds = array<i64: 1>, scalar_prefetch = 0 : i64, scratch_operands = 0 : i64, tpu.core_type = #tpu.core_type<tc>, window_params = [{transform_indices = @transform_0, window_bounds = array<i64: 8, 441>}, {transform_indices = @transform_1, window_bounds = array<i64: 8, 1>}, {pipeline_mode = #tpu.pipeline_mode<synchronous>, transform_indices = @transform_2, window_bounds = array<i64: 441, 64>}, {pipeline_mode = #tpu.pipeline_mode<synchronous>, transform_indices = @transform_3, window_bounds = array<i64: 1, 64>}, {pipeline_mode = #tpu.pipeline_mode<synchronous>, transform_indices = @transform_4, window_bounds = array<i64: 64, 64>}, {pipeline_mode = #tpu.pipeline_mode<synchronous>, transform_indices = @transform_5, window_bounds = array<i64: 1, 64>}, {pipeline_mode = #tpu.pipeline_mode<synchronous>, transform_indices = @transform_6, window_bounds = array<i64: 64, 128>}, {pipeline_mode = #tpu.pipeline_mode<synchronous>, transform_indices = @transform_7, window_bounds = array<i64: 1, 128>}, {transform_indices = @transform_8, window_bounds = array<i64: 8, 128>}]} {
    %c0 = arith.constant 0 : index
    %c0_0 = arith.constant 0 : index
    %0 = vector.load %arg1[%c0, %c0_0] : memref<8x441xf32, #tpu.memory_space<vmem>>, vector<8x441xf32>
    %cst = arith.constant dense<0xFF800000> : vector<8xf32>
    %1 = vector.multi_reduction <maximumf>, %0, %cst [1] : vector<8x441xf32> to vector<8xf32>
    %2 = vector.shape_cast %1 : vector<8xf32> to vector<8x1xf32>
    %3 = vector.broadcast %2 : vector<8x1xf32> to vector<8x441xf32>
    %4 = arith.subf %0, %3 : vector<8x441xf32>
    %5 = math.exp %4 : vector<8x441xf32>
    %cst_1 = arith.constant dense<0.000000e+00> : vector<8xf32>
    %6 = vector.multi_reduction <add>, %5, %cst_1 [1] : vector<8x441xf32> to vector<8xf32>
    %7 = vector.shape_cast %6 : vector<8xf32> to vector<8x1xf32>
    %8 = tpu.reciprocal %7 {approx = true} : vector<8x1xf32> -> vector<8x1xf32>
    %9 = arith.truncf %5 : vector<8x441xf32> to vector<8x441xbf16>
    %c0_2 = arith.constant 0 : index
    %c0_3 = arith.constant 0 : index
    %10 = vector.load %arg3[%c0_2, %c0_3] : memref<441x64xbf16, #tpu.memory_space<vmem>>, vector<441x64xbf16>
    %cst_4 = arith.constant dense<0.000000e+00> : vector<8x64xf32>
    %11 = tpu.matmul %9, %10, %cst_4 {dimension_numbers = #tpu.dot_dimension_numbers<[1], [0], [0], [1], [0, 0, 1, 1], [], []>} : vector<8x441xbf16>, vector<441x64xbf16>, vector<8x64xf32> -> vector<8x64xf32>
    %12 = vector.broadcast %8 : vector<8x1xf32> to vector<8x64xf32>
    %13 = arith.mulf %11, %12 : vector<8x64xf32>
    %c0_5 = arith.constant 0 : index
    %c0_6 = arith.constant 0 : index
    %14 = vector.load %arg4[%c0_5, %c0_6] : memref<1x64xf32, #tpu.memory_space<vmem>>, vector<1x64xf32>
    %15 = vector.broadcast %14 : vector<1x64xf32> to vector<8x64xf32>
    %16 = arith.addf %13, %15 : vector<8x64xf32>
    %cst_7 = arith.constant 0.000000e+00 : f32
    %17 = vector.broadcast %cst_7 : f32 to vector<8x64xf32>
    %18 = arith.maximumf %16, %17 : vector<8x64xf32>
    %19 = arith.truncf %18 : vector<8x64xf32> to vector<8x64xbf16>
    %c0_8 = arith.constant 0 : index
    %c0_9 = arith.constant 0 : index
    %20 = vector.load %arg5[%c0_8, %c0_9] : memref<64x64xbf16, #tpu.memory_space<vmem>>, vector<64x64xbf16>
    %cst_10 = arith.constant dense<0.000000e+00> : vector<8x64xf32>
    %21 = tpu.matmul %19, %20, %cst_10 {dimension_numbers = #tpu.dot_dimension_numbers<[1], [0], [0], [1], [0, 0, 1, 1], [], []>} : vector<8x64xbf16>, vector<64x64xbf16>, vector<8x64xf32> -> vector<8x64xf32>
    %c0_11 = arith.constant 0 : index
    %c0_12 = arith.constant 0 : index
    %22 = vector.load %arg6[%c0_11, %c0_12] : memref<1x64xf32, #tpu.memory_space<vmem>>, vector<1x64xf32>
    %23 = vector.broadcast %22 : vector<1x64xf32> to vector<8x64xf32>
    %24 = arith.addf %21, %23 : vector<8x64xf32>
    %cst_13 = arith.constant 0.000000e+00 : f32
    %25 = vector.broadcast %cst_13 : f32 to vector<8x64xf32>
    %26 = arith.maximumf %24, %25 : vector<8x64xf32>
    %27 = arith.truncf %26 : vector<8x64xf32> to vector<8x64xbf16>
    %c0_14 = arith.constant 0 : index
    %c0_15 = arith.constant 0 : index
    %28 = vector.load %arg7[%c0_14, %c0_15] : memref<64x128xbf16, #tpu.memory_space<vmem>>, vector<64x128xbf16>
    %cst_16 = arith.constant dense<0.000000e+00> : vector<8x128xf32>
    %29 = tpu.matmul %27, %28, %cst_16 {dimension_numbers = #tpu.dot_dimension_numbers<[1], [0], [0], [1], [0, 0, 1, 1], [], []>} : vector<8x64xbf16>, vector<64x128xbf16>, vector<8x128xf32> -> vector<8x128xf32>
    %c0_17 = arith.constant 0 : index
    %c0_18 = arith.constant 0 : index
    %30 = vector.load %arg8[%c0_17, %c0_18] : memref<1x128xf32, #tpu.memory_space<vmem>>, vector<1x128xf32>
    %31 = vector.broadcast %30 : vector<1x128xf32> to vector<8x128xf32>
    %32 = arith.addf %29, %31 : vector<8x128xf32>
    %cst_19 = arith.constant dense<0xFF800000> : vector<8xf32>
    %33 = vector.multi_reduction <maximumf>, %32, %cst_19 [1] : vector<8x128xf32> to vector<8xf32>
    %34 = vector.shape_cast %33 : vector<8xf32> to vector<8x1xf32>
    %35 = vector.broadcast %34 : vector<8x1xf32> to vector<8x128xf32>
    %36 = arith.subf %32, %35 : vector<8x128xf32>
    %37 = math.exp %36 : vector<8x128xf32>
    %cst_20 = arith.constant dense<0.000000e+00> : vector<8xf32>
    %38 = vector.multi_reduction <add>, %37, %cst_20 [1] : vector<8x128xf32> to vector<8xf32>
    %39 = vector.shape_cast %38 : vector<8xf32> to vector<8x1xf32>
    %40 = math.log %39 : vector<8x1xf32>
    %41 = arith.addf %40, %34 : vector<8x1xf32>
    %42 = vector.broadcast %41 : vector<8x1xf32> to vector<8x128xf32>
    %43 = arith.subf %32, %42 : vector<8x128xf32>
    %c0_21 = arith.constant 0 : index
    %c0_22 = arith.constant 0 : index
    %44 = vector.load %arg2[%c0_21, %c0_22] : memref<8x1xi32, #tpu.memory_space<vmem>>, vector<8x1xi32>
    %45 = tpu.iota {dimensions = array<i32: 1>} : vector<8x128xi32>
    %46 = vector.broadcast %44 : vector<8x1xi32> to vector<8x128xi32>
    %47 = arith.cmpi eq, %45, %46 : vector<8x128xi32>
    %cst_23 = arith.constant 0.000000e+00 : f32
    %48 = vector.broadcast %cst_23 : f32 to vector<8x128xf32>
    %49 = arith.select %47, %43, %48 : vector<8x128xi1>, vector<8x128xf32>
    %cst_24 = arith.constant dense<0.000000e+00> : vector<8xf32>
    %50 = vector.multi_reduction <add>, %49, %cst_24 [1] : vector<8x128xf32> to vector<8xf32>
    %51 = vector.shape_cast %50 : vector<8xf32> to vector<8x1xf32>
    %c127_i32 = arith.constant 127 : i32
    %52 = vector.broadcast %c127_i32 : i32 to vector<8x128xi32>
    %53 = arith.cmpi eq, %45, %52 : vector<8x128xi32>
    %54 = vector.shape_cast %51 : vector<8x1xf32> to vector<8x1xf32>
    %55 = vector.broadcast %54 : vector<8x1xf32> to vector<8x128xf32>
    %56 = arith.select %53, %55, %32 : vector<8x128xi1>, vector<8x128xf32>
    %c0_25 = arith.constant 0 : index
    %c0_26 = arith.constant 0 : index
    %57 = vector.load %arg9[%c0_25, %c0_26] : memref<8x128xf32, #tpu.memory_space<vmem>>, vector<8x128xf32>
    tpu.vector_store %arg9[%c0_25, %c0_26], %56 {strides = array<i32>} : memref<8x128xf32, #tpu.memory_space<vmem>>, vector<8x128xf32>,
    return
  }
  func.func @transform_0(%arg0: i32) -> (i32, i32) {
    %c0_i32 = arith.constant 0 : i32
    %c0_i32_0 = arith.constant 0 : i32
    return %arg0, %c0_i32 : i32, i32
  }
  func.func @transform_1(%arg0: i32) -> (i32, i32) {
    %c0_i32 = arith.constant 0 : i32
    %c0_i32_0 = arith.constant 0 : i32
    return %arg0, %c0_i32 : i32, i32
  }
  func.func @transform_2(%arg0: i32) -> (i32, i32) {
    %c0_i32 = arith.constant 0 : i32
    %c0_i32_0 = arith.constant 0 : i32
    %c0_i32_1 = arith.constant 0 : i32
    return %c0_i32, %c0_i32_0 : i32, i32
  }
  func.func @transform_3(%arg0: i32) -> (i32, i32) {
    %c0_i32 = arith.constant 0 : i32
    %c0_i32_0 = arith.constant 0 : i32
    %c0_i32_1 = arith.constant 0 : i32
    return %c0_i32, %c0_i32_0 : i32, i32
  }
  func.func @transform_4(%arg0: i32) -> (i32, i32) {
    %c0_i32 = arith.constant 0 : i32
    %c0_i32_0 = arith.constant 0 : i32
    %c0_i32_1 = arith.constant 0 : i32
    return %c0_i32, %c0_i32_0 : i32, i32
  }
  func.func @transform_5(%arg0: i32) -> (i32, i32) {
    %c0_i32 = arith.constant 0 : i32
    %c0_i32_0 = arith.constant 0 : i32
    %c0_i32_1 = arith.constant 0 : i32
    return %c0_i32, %c0_i32_0 : i32, i32
  }
  func.func @transform_6(%arg0: i32) -> (i32, i32) {
    %c0_i32 = arith.constant 0 : i32
    %c0_i32_0 = arith.constant 0 : i32
    %c0_i32_1 = arith.constant 0 : i32
    return %c0_i32, %c0_i32_0 : i32, i32
  }
  func.func @transform_7(%arg0: i32) -> (i32, i32) {
    %c0_i32 = arith.constant 0 : i32
    %c0_i32_0 = arith.constant 0 : i32
    %c0_i32_1 = arith.constant 0 : i32
    return %c0_i32, %c0_i32_0 : i32, i32
  }
  func.func @transform_8(%arg0: i32) -> (i32, i32) {
    %c0_i32 = arith.constant 0 : i32
    %c0_i32_0 = arith.constant 0 : i32
    return %arg0, %c0_i32 : i32, i32
  }
}

</mosaic_0001>

<bundles_post_ra>
// kernel: categorical_actor_forward.1
= control target key start
LH: loop header
LB: loop body
LE: loop exit
PB: predicated region body
PF: predicated region fallthrough
CT: control target
= control target key end

     0   :  { %vm53_vm0 = vcmask 465920   ;;  %vm364_vm1 = vcmask 1043456   ;;  %vm365_vm2 = vcmask 1044480   ;;  %v811_v27 = vmov 65535   ;;  %s1019_s0 = inlined_call_operand.vmem [shape: f32[2,441], index: 0, kind: input, shape index: {}]   ;;  %s1020_s1 = inlined_call_operand.vmem [shape: s32[2,1], index: 1, kind: input, shape index: {}]   ;;  %s1021_s2 = inlined_call_operand.vmem [shape: bf16[441,64], index: 2, kind: input, shape index: {}]   ;;  %s1022_s3 = inlined_call_operand.vmem [shape: f32[1,64], index: 3, kind: input, shape index: {}]   ;;  %s1023_s4 = inlined_call_operand.vmem [shape: bf16[64,64], index: 4, kind: input, shape index: {}]   ;;  %s1024_s5 = inlined_call_operand.vmem [shape: f32[1,64], index: 5, kind: input, shape index: {}]   ;;  %s1025_s6 = inlined_call_operand.vmem [shape: bf16[64,128], index: 6, kind: input, shape index: {}]   ;;  %s1026_s7 = inlined_call_operand.vmem [shape: f32[1,128], index: 7, kind: input, shape index: {}]   ;;  %s1027_s8 = inlined_call_operand.vmem [shape: f32[2,128], index: 8, kind: output, shape index: {}]  }
   0x1   :  { %v865_v0 = vld [vmem:[%s1019_s0] sm:$0xff]  ;;  %v870_v1 = vld [vmem:[%s1019_s0 + $0x8] sm:$0xff]  ;;  %v875_v2 = vld [vmem:[%s1019_s0 + $0x10] sm:$0xff]  ;;  %v366_v28 = vsel %vm364_vm1, 4294967295, %v811_v27  ;;  %v812_v40 = vmov 269488144  }
   0x2   :  { %v880_v3 = vld [vmem:[%s1019_s0 + $0x18] sm:$0xff]  ;;  %38 = vst [vmem:[#allocation1] ss:$4 sm:$0xff] %v865_v0  ;;  %v756_v15 = vld [vmem:[%s1021_s2 + $0x30] sm:$0xff]  ;;  %v755_v18 = vld [vmem:[%s1021_s2 + $0x28] sm:$0xff]  ;;  %v367_v32 = vsel %vm365_vm2, %v366_v28, 0  ;;  %v62_v41 = vunpack.c.l.s4 %v812_v40 }
   0x3   :  { %40 = vst [vmem:[#allocation1 + $0x1] ss:$4 sm:$0xff] %v870_v1  ;;  %v757_v12 = vld [vmem:[%s1021_s2 + $0x38] sm:$0xff]  ;;  %v764_v16 = vld [vmem:[%s1021_s2 + $0x70] sm:$0xff]  ;;  %v763_v19 = vld [vmem:[%s1021_s2 + $0x68] sm:$0xff]  ;;  %vm467_vm3 = vcmask 523264  }
   0x4   :  { %42 = vst [vmem:[#allocation1 + $0x2] ss:$4 sm:$0xff] %v875_v2  ;;  %v765_v13 = vld [vmem:[%s1021_s2 + $0x78] sm:$0xff]  ;;  %371 = vmatpush.bf16.msra.mxu0 %v757_v12  ;;  %v772_v17 = vld [vmem:[%s1021_s2 + $0xb0] sm:$0xff]  ;;  %v771_v20 = vld [vmem:[%s1021_s2 + $0xa8] sm:$0xff]  ;;  %v63_v50 = vunpack.c.0.s8 %v62_v41 }
   0x5   :  { %44 = vst [vmem:[#allocation1 + $0x3] ss:$4 sm:$0xff] %v880_v3  ;;  %v773_v14 = vld [vmem:[%s1021_s2 + $0xb8] sm:$0xff]  ;;  %384 = vmatpush.bf16.msra.mxu1 %v765_v13  ;;  %v754_v21 = vld [vmem:[%s1021_s2 + $0x20] sm:$0xff]  ;;  %v752_v34 = vld [vmem:[%s1021_s2 + $0x10] sm:$0xff] }
   0x6   :  { %397 = vmatpush.bf16.msra.mxu2 %v773_v14  ;;  %v762_v22 = vld [vmem:[%s1021_s2 + $0x60] sm:$0xff]  ;;  %v713_v24 = vld [vmem:[%s1021_s2 + $0xd8] sm:$0xf]  ;;  %v777_v25 = vld [vmem:[%s1021_s2 + $0xd8] sm:$0x10] }
   0x7   :  { %v770_v23 = vld [vmem:[%s1021_s2 + $0xa0] sm:$0xff]  ;;  %v714_v26 = vor.u32 %v777_v25, %v713_v24  ;;  %v753_v29 = vld [vmem:[%s1021_s2 + $0x18] sm:$0xff]  ;;  %v760_v35 = vld [vmem:[%s1021_s2 + $0x50] sm:$0xff]  ;;  %v813_v42 = vmov 842150450  }
   0x8   :  { %372 = vmatpush.bf16.msra.mxu0 %v756_v15  ;;  %v761_v30 = vld [vmem:[%s1021_s2 + $0x58] sm:$0xff]  ;;  %v768_v36 = vld [vmem:[%s1021_s2 + $0x90] sm:$0xff]  ;;  %v751_v38 = vld [vmem:[%s1021_s2 + $0x8] sm:$0xff]  ;;  %v66_v43 = vunpack.c.l.s4 %v813_v42  ;;  %v814_v44 = vmov 1414812756  }
   0x9   :  { %385 = vmatpush.bf16.msra.mxu1 %v764_v16  ;;  %v769_v31 = vld [vmem:[%s1021_s2 + $0x98] sm:$0xff]  ;;  %v369_v33 = vand.u32 %v714_v26, %v367_v32  ;;  %v776_v37 = vld [vmem:[%s1021_s2 + $0xd0] sm:$0xff]  ;;  %v759_v39 = vld [vmem:[%s1021_s2 + $0x48] sm:$0xff]  ;;  %v70_v45 = vunpack.c.l.s4 %v814_v44  ;;  %v815_v46 = vmov 1987475062  }
   0xa   :  { %398 = vmatpush.bf16.msra.mxu2 %v772_v17  ;;  %v74_v47 = vunpack.c.l.s4 %v815_v46  ;;  %v767_v48 = vld [vmem:[%s1021_s2 + $0x88] sm:$0xff]  ;;  %v67_v51 = vunpack.c.0.s8 %v66_v43  ;;  %v750_v54 = vld [vmem:[%s1021_s2] sm:$0xff]  ;;  %v781_v27 = vld [vmem:[%s1023_s4 + $0x18] sm:$0xff] }
   0xb   :  { %414 = vmatpush.bf16.msra.mxu3 %v369_v33  ;;  %v775_v49 = vld [vmem:[%s1021_s2 + $0xc8] sm:$0xff]  ;;  %v71_v52 = vunpack.c.0.s8 %v70_v45  ;;  %v758_v55 = vld [vmem:[%s1021_s2 + $0x40] sm:$0xff]  ;;  %v780_v28 = vld [vmem:[%s1023_s4 + $0x10] sm:$0xff] }
   0xc   :  { %v45_v4 = vld.sshfl [vmem:[#allocation1] sm:$0xff pattern:$0x73625140]  ;;  %v46_v5 = vld.sshfl [vmem:[#allocation1 + $0x8] sm:$0xff pattern:$0x73625140]  ;;  %373 = vmatpush.bf16.msra.mxu0 %v755_v18  ;;  %v75_v53 = vunpack.c.0.s8 %v74_v47 }
   0xd   :  { %v47_v6 = vld.sshfl [vmem:[#allocation1 + $0x10] sm:$0xff pattern:$0x73625140]  ;;  %v48_v7 = vld.sshfl [vmem:[#allocation1 + $0x18] sm:$0xff pattern:$0x73625140]  ;;  %v55_v8 = vmax.f32 %v45_v4, %v46_v5  ;;  %386 = vmatpush.bf16.msra.mxu1 %v763_v19 }
   0xe   :  { %v54_v9 = vsel %vm53_vm0, %v48_v7, -inf  ;;  %399 = vmatpush.bf16.msra.mxu2 %v771_v20  ;;  %v766_v56 = vld [vmem:[%s1021_s2 + $0x80] sm:$0xff]  ;;  %v784_v32 = vld [vmem:[%s1025_s6 + $0x10] sm:$0xff]  ;;  %v783_v33 = vld [vmem:[%s1025_s6 + $0x8] sm:$0xff] }
   0xf   :  { %v56_v10 = vmax.f32 %v47_v6, %v54_v9  ;;  %415 = vmatpush.bf16.msra.mxu3 %v776_v37  ;;  %v774_v58 = vld [vmem:[%s1021_s2 + $0xc0] sm:$0xff] }
  0x10   :  { %374 = vmatpush.bf16.msra.mxu0 %v754_v21  ;;  %v794_v44 = vld [vmem:[%s1022_s3] ss:$0 sm:$0xff] }
  0x11   :  { %v57_v11 = vmax.f32 %v55_v8, %v56_v10  ;;  %387 = vmatpush.bf16.msra.mxu1 %v762_v22 }
  0x12   :  { %400 = vmatpush.bf16.msra.mxu2 %v770_v23 }
  0x13   :  { %58 = vmax.xlane.f32.xlu0 %v57_v11  ;;  %416 = vmatpush.bf16.msra.mxu3 %v775_v49 }
  0x14   :  { %375 = vmatpush.bf16.msra.mxu0 %v753_v29  ;;  %v779_v29 = vld [vmem:[%s1023_s4 + $0x8] sm:$0xff] }
  0x15   :  { %388 = vmatpush.bf16.msra.mxu1 %v761_v30  ;;  %v778_v30 = vld [vmem:[%s1023_s4] sm:$0xff] }
  0x16   :  { %401 = vmatpush.bf16.msra.mxu2 %v769_v31  ;;  %v785_v31 = vld [vmem:[%s1025_s6 + $0x18] sm:$0xff] }
  0x17   :  { %417 = vmatpush.bf16.msra.mxu3 %v774_v58 }
  0x18   :  { %376 = vmatpush.bf16.msra.mxu0 %v752_v34 }
  0x19   :  { %389 = vmatpush.bf16.msra.mxu1 %v760_v35 }
  0x1a   :  { %402 = vmatpush.bf16.msra.mxu2 %v768_v36 }
  0x1b   :  { %475 = vmatpush.bf16.msrb.mxu3 %v781_v27 }
  0x1c   :  { %377 = vmatpush.bf16.msra.mxu0 %v751_v38 }
  0x1d   :  { %390 = vmatpush.bf16.msra.mxu1 %v759_v39 }
  0x1e   :  { %403 = vmatpush.bf16.msra.mxu2 %v767_v48 }
  0x1f   :  { %476 = vmatpush.bf16.msrb.mxu3 %v780_v28 }
  0x20   :  { %378 = vmatpush.bf16.msra.mxu0 %v750_v54 }
  0x21   :  { %391 = vmatpush.bf16.msra.mxu1 %v758_v55 }
  0x22   :  { %404 = vmatpush.bf16.msra.mxu2 %v766_v56 }
  0x23   :  { %477 = vmatpush.bf16.msrb.mxu3 %v779_v29 }
  0x24   :  { %529 = vmatpush.bf16.msrb.mxu0 %v785_v31 }
  0x27   :  { %478 = vmatpush.bf16.msrb.mxu3 %v778_v30 }
  0x28   :  { %530 = vmatpush.bf16.msrb.mxu0 %v784_v32 }
  0x2c   :  { %531 = vmatpush.bf16.msrb.mxu0 %v783_v33 }
  0x86   :  { %v59_v57 = vpop.xlane.xlu0 %58 }
  0x87   :  { %v64_v59 = vperm.slane %v59_v57, %v63_v50  ;;  %v68_v60 = vperm.slane %v59_v57, %v67_v51  ;;  %v72_v61 = vperm.slane %v59_v57, %v71_v52  ;;  %v76_v62 = vperm.slane %v59_v57, %v75_v53  ;;  %v782_v52 = vld [vmem:[%s1025_s6] sm:$0xff] }
  0x88   :  { %532 = vmatpush.bf16.msrb.mxu0 %v782_v52  ;;  %v795_v53 = vld [vmem:[%s1024_s5] ss:$0 sm:$0xff] }
  0x89   :  { %v81_v63 = vsub.f32 %v865_v0, %v64_v59  ;;  %v82_v4 = vsub.f32 %v870_v1, %v68_v60  ;;  %v83_v5 = vsub.f32 %v875_v2, %v72_v61  ;;  %v84_v6 = vsub.f32 %v880_v3, %v76_v62  ;;  %v796_v59 = vld [vmem:[%s1026_s7] ss:$0 sm:$0xff] }
  0x8b   :  { %v85_v7 = vmul.f32 1.442695, %v81_v63  ;;  %v87_v8 = vmul.f32 1.442695, %v82_v4  ;;  %v89_v9 = vmul.f32 1.442695, %v83_v5 }
  0x8c   :  { %v91_v10 = vmul.f32 1.442695, %v84_v6  ;;  %v549_v63 = vld [vmem:[%s1020_s1] sm:$0xff]  ;;  %v816_v4 = vmov 0  }
  0x8d   :  { %797 = vpow2.f32 %v85_v7  ;;  %792 = vset.pattern.permute.xlu2 %v816_v4  ;;  %793 = vset.pattern.permute.xlu0 %v816_v4 }
  0x8e   :  { %799 = vpow2.f32 %v87_v8  ;;  %553 = vperm.xlu2 %792, %v549_v63  }
  0x8f   :  { %801 = vpow2.f32 %v89_v9 }
  0x90   :  { %803 = vpow2.f32 %v91_v10  ;;  %v550_v10 = vlaneseq }
  0x93   :  { %v798_v11 = vpop.eup %797 }
  0x94   :  { %v800_v12 = vpop.eup %799  ;;  %97 = vst [vmem:[#allocation1] ss:$4 sm:$0xff] %v798_v11 }
  0x95   :  { %v802_v13 = vpop.eup %801  ;;  %99 = vst [vmem:[#allocation1 + $0x1] ss:$4 sm:$0xff] %v800_v12 }
  0x96   :  { %v804_v0 = vpop.eup %803  ;;  %101 = vst [vmem:[#allocation1 + $0x2] ss:$4 sm:$0xff] %v802_v13 }
  0x97   :  { %103 = vst [vmem:[#allocation1 + $0x3] ss:$4 sm:$0xff] %v804_v0 }
  0x9e   :  { %v104_v1 = vld.sshfl [vmem:[#allocation1] sm:$0xff pattern:$0x73625140]  ;;  %v105_v2 = vld.sshfl [vmem:[#allocation1 + $0x8] sm:$0xff pattern:$0x73625140] }
  0x9f   :  { %v106_v3 = vld.sshfl [vmem:[#allocation1 + $0x10] sm:$0xff pattern:$0x73625140]  ;;  %v107_v14 = vld.sshfl [vmem:[#allocation1 + $0x18] sm:$0xff pattern:$0x73625140]  ;;  %v112_v15 = vadd.f32 %v105_v2, %v104_v1 }
  0xa0   :  { %119 = vst [vmem:[#allocation1] ss:$4 sm:$0xff] %v798_v11  ;;  %v114_v17 = vsel %vm53_vm0, %v107_v14, 0.0 }
  0xa1   :  { %v113_v16 = vadd.f32 %v112_v15, %v106_v3  ;;  %121 = vst [vmem:[#allocation1 + $0x1] ss:$4 sm:$0xff] %v800_v12  ;;  %v551_v12 = vand.u32 127, %v550_v10 }
  0xa2   :  { %123 = vst [vmem:[#allocation1 + $0x2] ss:$4 sm:$0xff] %v802_v13 }
  0xa3   :  { %v115_v18 = vadd.f32 %v114_v17, %v113_v16  ;;  %125 = vst [vmem:[#allocation1 + $0x3] ss:$4 sm:$0xff] %v804_v0  ;;  %vm559_vm5 = vcmp.eq.s32.totalorder %v551_v12, 127 }
  0xa5   :  { %116 = vadd.xlane.f32.xlu0 %v115_v18 }
  0xaa   :  { %v126_v19 = vld.sshfl [vmem:[#allocation1] sm:$0xff pattern:$0x73625140]  ;;  %v127_v20 = vld.sshfl [vmem:[#allocation1 + $0x8] sm:$0xff pattern:$0x73625140] }
  0xab   :  { %v134_v21 = vpack.c.bf16 %v126_v19, %v126_v19  ;;  %v135_v22 = vpack.c.bf16 %v127_v20, %v127_v20  ;;  %v128_v23 = vld.sshfl [vmem:[#allocation1 + $0x10] sm:$0xff pattern:$0x73625140]  ;;  %v129_v24 = vld.sshfl [vmem:[#allocation1 + $0x18] sm:$0xff pattern:$0x73625140] }
  0xac   :  { %v136_v25 = vpack.c.bf16 %v128_v23, %v128_v23  ;;  %v137_v26 = vpack.c.bf16 %v129_v24, %v129_v24 }
  0xad   :  { %379 = vmatmul.bf16.vlgmr.msra.gmra.mxu0 %v134_v21  ;;  %392 = vmatmul.bf16.vlgmr.msra.gmra.mxu1 %v135_v22 }
  0xae   :  { %405 = vmatmul.bf16.vlgmr.msra.gmra.mxu2 %v136_v25  ;;  %715 = vmatmul.msk.bf16.vlgmr.msra.gmra.mxu3 %vm53_vm0, %v137_v26 }
  0xe8   :  { %v554_v0 = vpop.permute.xlu2 %553 }
  0xe9   :  { %vm555_vm4 = vcmp.eq.s32.totalorder %v551_v12, %v554_v0 }
 0x118   :  { %v117_v36 = vpop.xlane.xlu0 %116 }
 0x119   :  { %805 = vrcp.f32 %v117_v36 }
 0x11f   :  { %v806_v45 = vpop.eup %805 }
 0x12a   :  { %v380_v34 = vpop.f32.mrf.mxu0  ;;  %v393_v35 = vpop.f32.mrf.mxu1 }
 0x12b   :  { %v394_v37 = vadd.f32 %v393_v35, %v380_v34 }
 0x131   :  { %v406_v38 = vpop.f32.mrf.mxu2  ;;  %v419_v39 = vpop.f32.mrf.mxu3 }
 0x132   :  { %v407_v40 = vadd.f32 %v406_v38, %v394_v37  ;;  %v382_v41 = vpop.f32.mrf.mxu0  ;;  %v395_v42 = vpop.f32.mrf.mxu1 }
 0x134   :  { %v420_v43 = vadd.f32 %v419_v39, %v407_v40 }
 0x136   :  { %v423_v46 = vmul.f32 %v806_v45, %v420_v43 }
 0x138   :  { %v428_v47 = vadd.f32 %v794_v44, %v423_v46 }
 0x139   :  { %v408_v48 = vpop.f32.mrf.mxu2  ;;  %v421_v49 = vpop.f32.mrf.mxu3 }
 0x13a   :  { %v429_v50 = vmax.f32 %v428_v47, 0.0 }
 0x13c   :  { %v430_v51 = vpack.c.bf16 %v429_v50, %v429_v50 }
 0x13e   :  { %732 = vmatmul.msk.bf16.vlgmr.msrb.gmra.mxu3 %vm467_vm3, %v430_v51 }
 0x1c1   :  { %v480_v54 = vpop.f32.mrf.mxu3 }
 0x1c2   :  { %v481_v55 = vadd.f32 %v795_v53, %v480_v54 }
 0x1c4   :  { %v484_v56 = vmax.f32 %v481_v55, 0.0 }
 0x1c6   :  { %v485_v57 = vpack.c.bf16 %v484_v56, %v484_v56 }
 0x1c8   :  { %749 = vmatmul.msk.bf16.vlgmr.msrb.gmra.mxu0 %vm467_vm3, %v485_v57 }
 0x1c9   :  { %v482_v58 = vpop.f32.mrf.mxu3 }
 0x245   :  { %v534_v60 = vpop.f32.mrf.mxu0 }
 0x246   :  { %v535_v61 = vadd.f32 %v796_v59, %v534_v60 }
 0x248   :  { %538 = vmax.xlane.f32.xlu1 %v535_v61 }
 0x24d   :  { %v536_v62 = vpop.f32.mrf.mxu0 }
 0x2bb   :  { %v539_v5 = vpop.xlane.xlu1 %538 }
 0x2bc   :  { %v540_v6 = vsub.f32 %v535_v61, %v539_v5 }
 0x2be   :  { %v541_v7 = vmul.f32 1.442695, %v540_v6 }
 0x2c0   :  { %807 = vpow2.f32 %v541_v7 }
 0x2c6   :  { %v808_v8 = vpop.eup %807 }
 0x2c7   :  { %543 = vadd.xlane.f32.xlu1 %v808_v8 }
 0x33a   :  { %v544_v9 = vpop.xlane.xlu1 %543 }
 0x33b   :  { %809 = vlog2.f32 %v544_v9 }
 0x341   :  { %v810_v11 = vpop.eup %809 }
 0x342   :  { %v546_v13 = vmul.f32 0.6931472, %v810_v11 }
 0x344   :  { %v547_v1 = vadd.f32 %v546_v13, %v539_v5 }
 0x346   :  { %v548_v2 = vsub.f32 %v535_v61, %v547_v1 }
 0x348   :  { %v556_v3 = vsel %vm555_vm4, %v548_v2, 0.0 }
 0x349   :  { %557 = vadd.xlane.f32.xlu2 %v556_v3 }
 0x3bc   :  { %v558_v14 = vpop.xlane.xlu2 %557 }
 0x3bd   :  { %v560_v15 = vsel %vm559_vm5, %v558_v14, %v535_v61 }
 0x3be   :  { %561 = vst [vmem:[#allocation2] sm:$0xff] %v560_v15 }
 0x3c5   :  { %v580_v16 = vld [vmem:[#allocation2] sm:$0x3] }
 0x3c6   :  { %581 = vst [vmem:[%s1027_s8] sm:$0x3] %v580_v16 }

</bundles_post_ra>
